<compile_context>
chip_gen: v7x
topology: tpu7x:2x2x1
jax: 0.10.0
libtpu: 0.0.40
codegen_flags: <defaults>
</compile_context>

<pallas_src>
import numpy as np
import jax
import jax.numpy as jnp
from jax import lax
from jax.experimental import pallas as pl
from jax.experimental.pallas import tpu as pltpu


MODULE_SIZE = 4
SAMPLING_THRESHOLD = 0.1
SIGMA = 1.5


# ---------------- deterministic parameter setup (mirrors __init__) -----------

def _gaussian_kernel(size: int, sigma: float) -> np.ndarray:
    coords = np.arange(size, dtype=np.float32) - size // 2
    g = np.exp(-(coords ** 2) / (2.0 * sigma ** 2))
    kern = g[:, None] * g[None, :]
    return kern / kern.sum()


def _min_max_normalize(x: np.ndarray) -> np.ndarray:
    return (x - x.min()) / (x.max() - x.min())


def make_weight(module_size: int = MODULE_SIZE,
                threshold: float = SAMPLING_THRESHOLD,
                sigma: float = SIGMA) -> np.ndarray:
    f = _gaussian_kernel(module_size, sigma)
    f = _min_max_normalize(f)
    return np.where(f < threshold, 0.0, f).astype(np.float32)  # (k, k)


def _make_col_pool(w2d: np.ndarray, two: int) -> jnp.ndarray:
    """(k, TW, TWo) block-diagonal column-pooling matrices.

    m[i, b*k + j, b] = w2d[i, j], so (rows @ m[i]) pools the width axis by k
    with the i-th kernel row's weights, giving a lane-dense (rows, TWo) slab.
    """
    k = w2d.shape[0]
    tw = two * k
    m = np.zeros((k, tw, two), np.float32)
    for i in range(k):
        for b in range(two):
            m[i, b * k:(b + 1) * k, b] = w2d[i, :]
    return jnp.asarray(m)


# ---------------------------- Pallas kernel ----------------------------------

def _conv_kernel(x_ref, m_ref, o_ref, ysum_ref):
    # x_ref:    (1, C, THo, k, TW)  input tile, patch-row axis split out
    # m_ref:    (k, TW, TWo)        column-pooling matrices (constant block)
    # o_ref:    (1, 1, THo, TWo)    lane-dense output slab
    # ysum_ref: (THo, k, TW)        VMEM scratch for the channel sum
    C = x_ref.shape[1]
    k = m_ref.shape[0]
    THo = o_ref.shape[2]
    TWo = o_ref.shape[3]

    # Channel sum hoisted out of the kernel-row loop (VPU); per-tile cast to
    # f32 keeps accumulation in full precision even for bf16 inputs.
    ysum_ref[...] = x_ref[0, 0].astype(jnp.float32)
    for c in range(1, C):                       # static unroll, C == 3
        ysum_ref[...] += x_ref[0, c].astype(jnp.float32)

    acc = jnp.zeros((THo, TWo), jnp.float32)
    for i in range(k):                          # static unroll, k is tiny
        # Rows of kernel-row i, width-pooled on the MXU (lane-dense result).
        acc = acc + jnp.dot(ysum_ref[:, i, :], m_ref[i],
                            preferred_element_type=jnp.float32)
    o_ref[...] = acc[None, None].astype(o_ref.dtype)


# ------------------------------ tile sizing -----------------------------------

_VMEM_BUDGET = 26 * 1024 * 1024   # conservative: fits scoped VMEM on v5e/v6e/v7x


def _vmem_bytes(c, tho, two, k, in_itemsize):
    tw = two * k
    k_pad = -(-k // 8) * 8                       # k axis pads to 8 sublanes in VMEM
    x_blk = c * tho * k_pad * tw * in_itemsize   # double-buffered
    m_blk = k * tw * two * 4                     # double-buffered
    o_blk = max(tho, 8) * max(two, 128) * 4      # double-buffered
    scratch = tho * k_pad * tw * 4               # single ysum scratch
    return 2 * (x_blk + m_blk + o_blk) + scratch


def _pick_col_tile(wo: int) -> int:
    # Lane-dense 128-wide output slabs; bounded even for ragged widths
    # (partial last block handled by the cdiv grid).
    return 128 if wo % 128 == 0 else min(wo, 128)


def _pick_row_tile(ho: int, c: int, two: int, k: int, in_itemsize: int) -> int:
    cands = [t for t in (256, 128, 64, 32, 16, 8)
             if _vmem_bytes(c, t, two, k, in_itemsize) <= _VMEM_BUDGET]
    if not cands:
        cands = [8]
    for t in cands:
        if t <= ho and ho % t == 0:
            return t
    return min(ho, cands[0])   # bounded fallback; partial last block via cdiv grid


# ------------------------------- forward --------------------------------------

def sampling_simulation_forward(x: jnp.ndarray,
                                w2d: np.ndarray,
                                module_size: int = MODULE_SIZE) -> jnp.ndarray:
    """x: (N, 3, H, W) NCHW.  Returns (N, 1, H//k, W//k) float32."""
    N, C, H, W = x.shape
    k = module_size
    Ho, Wo = H // k, W // k

    # PyTorch Conv2d(stride=k, padding=0) floors the output size.  Only
    # materialize a slice when the spatial dims are not k-aligned; no dtype
    # cast here (cast happens per-tile inside the kernel).
    if H != Ho * k or W != Wo * k:
        x = x[:, :, :Ho * k, :Wo * k]
    # Free (metadata-only) reshape: split H into (Ho, k) so the kernel needs
    # only static slices instead of strided sublane reads.
    xr = x.reshape(N, C, Ho, k, Wo * k)

    TWo = _pick_col_tile(Wo)
    THo = _pick_row_tile(Ho, C, TWo, k, x.dtype.itemsize)
    TW = TWo * k
    m = _make_col_pool(np.asarray(w2d, np.float32), TWo)

    grid = (N, pl.cdiv(Ho, THo), pl.cdiv(Wo, TWo))

    # Report the dense MXU flops actually executed (block-diagonal waste incl.)
    flops = 2 * N * Ho * Wo * k * TW
    bytes_accessed = (xr.size * x.dtype.itemsize + N * Ho * Wo * 4
                      + int(m.size) * 4)

    out = pl.pallas_call(
        _conv_kernel,
        out_shape=jax.ShapeDtypeStruct((N, 1, Ho, Wo), jnp.float32),
        grid=grid,
        in_specs=[
            pl.BlockSpec((1, C, THo, k, TW), lambda n, r, w: (n, 0, r, 0, w)),
            # Constant ~1 MiB block revisited every step.  (Single-buffering it
            # would save ~1 MiB more VMEM; kept default-buffered for
            # portability since it is small after capping TWo at 128.)
            pl.BlockSpec((k, TW, TWo), lambda n, r, w: (0, 0, 0)),
        ],
        out_specs=pl.BlockSpec((1, 1, THo, TWo), lambda n, r, w: (n, 0, r, w)),
        scratch_shapes=[pltpu.VMEM((THo, k, TW), jnp.float32)],
        compiler_params=pltpu.CompilerParams(
            dimension_semantics=("parallel", "parallel", "parallel"),
            vmem_limit_bytes=32 * 1024 * 1024,
        ),
        cost_estimate=pl.CostEstimate(
            flops=flops, transcendentals=0, bytes_accessed=bytes_accessed),
    )(xr, m)
    return out


# --------------------------------- main ---------------------------------------

if __name__ == "__main__":
    key = jax.random.PRNGKey(0)
    k1, k2 = jax.random.split(key)
    w2d = make_weight()

    def reference(xin):
        cn = xin.shape[1]
        w_oihw = jnp.broadcast_to(jnp.asarray(w2d)[None, None, :, :],
                                  (1, cn, MODULE_SIZE, MODULE_SIZE))
        return lax.conv_general_dilated(
            xin.astype(jnp.float32), w_oihw,
            window_strides=(MODULE_SIZE, MODULE_SIZE),
            padding="VALID",
            dimension_numbers=("NCHW", "OIHW", "NCHW"))

    # Primary small test: (2, 3, 16, 16) -> (2, 1, 4, 4)
    x = jax.random.normal(k1, (2, 3, 16, 16), dtype=jnp.float32)
    y = jax.block_until_ready(sampling_simulation_forward(x, w2d, MODULE_SIZE))
    np.testing.assert_allclose(np.asarray(y), np.asarray(reference(x)),
                               rtol=1e-4, atol=1e-4)

    # Ragged spatial dims exercise the Conv2d flooring path:
    # (1, 3, 18, 19) -> (1, 1, 4, 4)
    x2 = jax.random.normal(k2, (1, 3, 18, 19), dtype=jnp.float32)
    y2 = jax.block_until_ready(sampling_simulation_forward(x2, w2d, MODULE_SIZE))
    np.testing.assert_allclose(np.asarray(y2), np.asarray(reference(x2)),
                               rtol=1e-4, atol=1e-4)

    print("KERNEL_OK")
</pallas_src>

<mosaic_0001>
module attributes {stable_mosaic.version = 11 : i64} {
  func.func @_conv_kernel(%arg0: i32, %arg1: i32, %arg2: i32, %arg3: memref<1x3x4x4x16xf32, #tpu.memory_space<vmem>>, %arg4: memref<4x16x4xf32, #tpu.memory_space<vmem>>, %arg5: memref<1x1x4x4xf32, #tpu.memory_space<vmem>>, %arg6: memref<4x4x16xf32, #tpu.memory_space<vmem>>) attributes {dimension_semantics = [#tpu.dimension_semantics<parallel>, #tpu.dimension_semantics<parallel>, #tpu.dimension_semantics<parallel>], iteration_bounds = array<i64: 2, 1, 1>, scalar_prefetch = 0 : i64, scratch_operands = 1 : i64, tpu.core_type = #tpu.core_type<tc>, window_params = [{transform_indices = @transform_0, window_bounds = array<i64: 1, 3, 4, 4, 16>}, {pipeline_mode = #tpu.pipeline_mode<synchronous>, transform_indices = @transform_1, window_bounds = array<i64: 4, 16, 4>}, {transform_indices = @transform_2, window_bounds = array<i64: 1, 1, 4, 4>}]} {
    %c0 = arith.constant 0 : index
    %c0_0 = arith.constant 0 : index
    %c0_1 = arith.constant 0 : index
    %c0_2 = arith.constant 0 : index
    %c0_3 = arith.constant 0 : index
    %0 = vector.load %arg3[%c0, %c0_0, %c0_1, %c0_2, %c0_3] : memref<1x3x4x4x16xf32, #tpu.memory_space<vmem>>, vector<1x1x4x4x16xf32>
    %1 = vector.shape_cast %0 : vector<1x1x4x4x16xf32> to vector<4x4x16xf32>
    %c0_4 = arith.constant 0 : index
    %c0_5 = arith.constant 0 : index
    %c0_6 = arith.constant 0 : index
    %2 = vector.load %arg6[%c0_4, %c0_5, %c0_6] : memref<4x4x16xf32, #tpu.memory_space<vmem>>, vector<4x4x16xf32>
    tpu.vector_store %arg6[%c0_4, %c0_5, %c0_6], %1 {strides = array<i32>} : memref<4x4x16xf32, #tpu.memory_space<vmem>>, vector<4x4x16xf32>,
    %c0_7 = arith.constant 0 : index
    %c0_8 = arith.constant 0 : index
    %c0_9 = arith.constant 0 : index
    %3 = vector.load %arg6[%c0_7, %c0_8, %c0_9] : memref<4x4x16xf32, #tpu.memory_space<vmem>>, vector<4x4x16xf32>
    %c0_10 = arith.constant 0 : index
    %c1 = arith.constant 1 : index
    %c0_11 = arith.constant 0 : index
    %c0_12 = arith.constant 0 : index
    %c0_13 = arith.constant 0 : index
    %4 = vector.load %arg3[%c0_10, %c1, %c0_11, %c0_12, %c0_13] : memref<1x3x4x4x16xf32, #tpu.memory_space<vmem>>, vector<1x1x4x4x16xf32>
    %5 = vector.shape_cast %4 : vector<1x1x4x4x16xf32> to vector<4x4x16xf32>
    %6 = arith.addf %3, %5 : vector<4x4x16xf32>
    %c0_14 = arith.constant 0 : index
    %c0_15 = arith.constant 0 : index
    %c0_16 = arith.constant 0 : index
    %7 = vector.load %arg6[%c0_14, %c0_15, %c0_16] : memref<4x4x16xf32, #tpu.memory_space<vmem>>, vector<4x4x16xf32>
    tpu.vector_store %arg6[%c0_14, %c0_15, %c0_16], %6 {strides = array<i32>} : memref<4x4x16xf32, #tpu.memory_space<vmem>>, vector<4x4x16xf32>,
    %c0_17 = arith.constant 0 : index
    %c0_18 = arith.constant 0 : index
    %c0_19 = arith.constant 0 : index
    %8 = vector.load %arg6[%c0_17, %c0_18, %c0_19] : memref<4x4x16xf32, #tpu.memory_space<vmem>>, vector<4x4x16xf32>
    %c0_20 = arith.constant 0 : index
    %c2 = arith.constant 2 : index
    %c0_21 = arith.constant 0 : index
    %c0_22 = arith.constant 0 : index
    %c0_23 = arith.constant 0 : index
    %9 = vector.load %arg3[%c0_20, %c2, %c0_21, %c0_22, %c0_23] : memref<1x3x4x4x16xf32, #tpu.memory_space<vmem>>, vector<1x1x4x4x16xf32>
    %10 = vector.shape_cast %9 : vector<1x1x4x4x16xf32> to vector<4x4x16xf32>
    %11 = arith.addf %8, %10 : vector<4x4x16xf32>
    %c0_24 = arith.constant 0 : index
    %c0_25 = arith.constant 0 : index
    %c0_26 = arith.constant 0 : index
    %12 = vector.load %arg6[%c0_24, %c0_25, %c0_26] : memref<4x4x16xf32, #tpu.memory_space<vmem>>, vector<4x4x16xf32>
    tpu.vector_store %arg6[%c0_24, %c0_25, %c0_26], %11 {strides = array<i32>} : memref<4x4x16xf32, #tpu.memory_space<vmem>>, vector<4x4x16xf32>,
    %cst = arith.constant 0.000000e+00 : f32
    %13 = vector.broadcast %cst : f32 to vector<4x4xf32>
    %c0_27 = arith.constant 0 : index
    %c0_28 = arith.constant 0 : index
    %c0_29 = arith.constant 0 : index
    %14 = vector.load %arg6[%c0_27, %c0_28, %c0_29] : memref<4x4x16xf32, #tpu.memory_space<vmem>>, vector<4x1x16xf32>
    %15 = vector.shape_cast %14 : vector<4x1x16xf32> to vector<4x16xf32>
    %c0_30 = arith.constant 0 : index
    %c0_31 = arith.constant 0 : index
    %c0_32 = arith.constant 0 : index
    %16 = vector.load %arg4[%c0_30, %c0_31, %c0_32] : memref<4x16x4xf32, #tpu.memory_space<vmem>>, vector<1x16x4xf32>
    %17 = vector.shape_cast %16 : vector<1x16x4xf32> to vector<16x4xf32>
    %cst_33 = arith.constant dense<0.000000e+00> : vector<4x4xf32>
    %18 = tpu.matmul %15, %17, %cst_33 {dimension_numbers = #tpu.dot_dimension_numbers<[1], [0], [0], [1], [0, 0, 1, 1], [], []>} : vector<4x16xf32>, vector<16x4xf32>, vector<4x4xf32> -> vector<4x4xf32>
    %19 = arith.addf %13, %18 : vector<4x4xf32>
    %c0_34 = arith.constant 0 : index
    %c1_35 = arith.constant 1 : index
    %c0_36 = arith.constant 0 : index
    %20 = vector.load %arg6[%c0_34, %c1_35, %c0_36] : memref<4x4x16xf32, #tpu.memory_space<vmem>>, vector<4x1x16xf32>
    %21 = vector.shape_cast %20 : vector<4x1x16xf32> to vector<4x16xf32>
    %c1_37 = arith.constant 1 : index
    %c0_38 = arith.constant 0 : index
    %c0_39 = arith.constant 0 : index
    %22 = vector.load %arg4[%c1_37, %c0_38, %c0_39] : memref<4x16x4xf32, #tpu.memory_space<vmem>>, vector<1x16x4xf32>
    %23 = vector.shape_cast %22 : vector<1x16x4xf32> to vector<16x4xf32>
    %cst_40 = arith.constant dense<0.000000e+00> : vector<4x4xf32>
    %24 = tpu.matmul %21, %23, %cst_40 {dimension_numbers = #tpu.dot_dimension_numbers<[1], [0], [0], [1], [0, 0, 1, 1], [], []>} : vector<4x16xf32>, vector<16x4xf32>, vector<4x4xf32> -> vector<4x4xf32>
    %25 = arith.addf %19, %24 : vector<4x4xf32>
    %c0_41 = arith.constant 0 : index
    %c2_42 = arith.constant 2 : index
    %c0_43 = arith.constant 0 : index
    %26 = vector.load %arg6[%c0_41, %c2_42, %c0_43] : memref<4x4x16xf32, #tpu.memory_space<vmem>>, vector<4x1x16xf32>
    %27 = vector.shape_cast %26 : vector<4x1x16xf32> to vector<4x16xf32>
    %c2_44 = arith.constant 2 : index
    %c0_45 = arith.constant 0 : index
    %c0_46 = arith.constant 0 : index
    %28 = vector.load %arg4[%c2_44, %c0_45, %c0_46] : memref<4x16x4xf32, #tpu.memory_space<vmem>>, vector<1x16x4xf32>
    %29 = vector.shape_cast %28 : vector<1x16x4xf32> to vector<16x4xf32>
    %cst_47 = arith.constant dense<0.000000e+00> : vector<4x4xf32>
    %30 = tpu.matmul %27, %29, %cst_47 {dimension_numbers = #tpu.dot_dimension_numbers<[1], [0], [0], [1], [0, 0, 1, 1], [], []>} : vector<4x16xf32>, vector<16x4xf32>, vector<4x4xf32> -> vector<4x4xf32>
    %31 = arith.addf %25, %30 : vector<4x4xf32>
    %c0_48 = arith.constant 0 : index
    %c3 = arith.constant 3 : index
    %c0_49 = arith.constant 0 : index
    %32 = vector.load %arg6[%c0_48, %c3, %c0_49] : memref<4x4x16xf32, #tpu.memory_space<vmem>>, vector<4x1x16xf32>
    %33 = vector.shape_cast %32 : vector<4x1x16xf32> to vector<4x16xf32>
    %c3_50 = arith.constant 3 : index
    %c0_51 = arith.constant 0 : index
    %c0_52 = arith.constant 0 : index
    %34 = vector.load %arg4[%c3_50, %c0_51, %c0_52] : memref<4x16x4xf32, #tpu.memory_space<vmem>>, vector<1x16x4xf32>
    %35 = vector.shape_cast %34 : vector<1x16x4xf32> to vector<16x4xf32>
    %cst_53 = arith.constant dense<0.000000e+00> : vector<4x4xf32>
    %36 = tpu.matmul %33, %35, %cst_53 {dimension_numbers = #tpu.dot_dimension_numbers<[1], [0], [0], [1], [0, 0, 1, 1], [], []>} : vector<4x16xf32>, vector<16x4xf32>, vector<4x4xf32> -> vector<4x4xf32>
    %37 = arith.addf %31, %36 : vector<4x4xf32>
    %38 = vector.shape_cast %37 : vector<4x4xf32> to vector<1x1x4x4xf32>
    %c0_54 = arith.constant 0 : index
    %c0_55 = arith.constant 0 : index
    %c0_56 = arith.constant 0 : index
    %c0_57 = arith.constant 0 : index
    %39 = vector.load %arg5[%c0_54, %c0_55, %c0_56, %c0_57] : memref<1x1x4x4xf32, #tpu.memory_space<vmem>>, vector<1x1x4x4xf32>
    tpu.vector_store %arg5[%c0_54, %c0_55, %c0_56, %c0_57], %38 {strides = array<i32>} : memref<1x1x4x4xf32, #tpu.memory_space<vmem>>, vector<1x1x4x4xf32>,
    return
  }
  func.func @transform_0(%arg0: i32, %arg1: i32, %arg2: i32) -> (i32, i32, i32, i32, i32) {
    %c0_i32 = arith.constant 0 : i32
    %c0_i32_0 = arith.constant 0 : i32
    %c0_i32_1 = arith.constant 0 : i32
    return %arg0, %c0_i32, %arg1, %c0_i32_0, %arg2 : i32, i32, i32, i32, i32
  }
  func.func @transform_1(%arg0: i32, %arg1: i32, %arg2: i32) -> (i32, i32, i32) {
    %c0_i32 = arith.constant 0 : i32
    %c0_i32_0 = arith.constant 0 : i32
    %c0_i32_1 = arith.constant 0 : i32
    %c0_i32_2 = arith.constant 0 : i32
    return %c0_i32, %c0_i32_0, %c0_i32_1 : i32, i32, i32
  }
  func.func @transform_2(%arg0: i32, %arg1: i32, %arg2: i32) -> (i32, i32, i32, i32) {
    %c0_i32 = arith.constant 0 : i32
    %c0_i32_0 = arith.constant 0 : i32
    return %arg0, %c0_i32, %arg1, %arg2 : i32, i32, i32, i32
  }
}

</mosaic_0001>

<bundles_post_ra>
// kernel: tpu_custom_call.1
= control target key start
LH: loop header
LB: loop body
LE: loop exit
PB: predicated region body
PF: predicated region fallthrough
CT: control target
= control target key end

     0   :  { %7 = vsyncpa [#allocation4], 0  ;;  %s1242_s0 = inlined_call_operand.hbm [shape: f32[2,3,4,4,16], index: 0, kind: input, shape index: {}]   ;;  %s1243_s1 = inlined_call_operand.vmem [shape: f32[4,16,4], index: 1, kind: input, shape index: {}]   ;;  %s1244_s2 = inlined_call_operand.hbm [shape: f32[2,1,4,4], index: 2, kind: output, shape index: {}]  }
   0x1   :  { %9 = vsyncpa [#allocation4 + $0x1], 0 }
   0x2   :  { %10 = vsyncpa [#allocation5], 0 }
   0x3   :  { %12 = vsyncpa [#allocation5 + $0x1], 0  ;;  %s994_s9 = smov 0   ;;  %s996_s10 = smov 0  }
   0x4   :  { %s998_s11 = smov 0   ;;  %s1000_s12 = smov 0  }
   0x5   :  { %s1002_s13 = smov 0   ;;  %s1004_s14 = smov 0  }
   0x6 LB: > { %s702_s15 = sadd.s32 4294967295, %s970_s14   ;;  %s703_s16 = sadd.s32 4294967294, %s970_s14   ;;  %s970_s14 = sphi %s1004_s14, %s18_s14   ;;  %s966_s13 = sphi %s1002_s13, %s1259_s13   ;;  %s962_s12 = sphi %s1000_s12, %s1258_s12   ;;  %s958_s11 = sphi %s998_s11, %s1257_s11   ;;  %s954_s10 = sphi %s996_s10, %s1256_s10   ;;  %s950_s9 = sphi %s994_s9, %s1255_s9  }
   0x7   : > { %s37_s17 = sadd.s32 1, %s966_s13  ;;  %s48_s18 = sadd.s32 1, %s958_s11 }
   0x8   : > { %p39_p0 = scmp.ge.s32.totalorder %s37_s17, 2  ;;  %p55_p1 = scmp.ne.s32.totalorder %s958_s11, %s954_s10 }
   0x9   : > { %p56_p2 = scmp.eq.s32.totalorder %s970_s14, 0  ;;  %p61_p3 = scmp.ne.s32.totalorder %s954_s10, %s950_s9 }
   0xa   : > { %s1261_s17 = smov (%p39_p0, %s37_s17), 0  ;;  %p62_p5 = scmp.eq.s32.totalorder %s702_s15, 0 }
   0xb   : > { %p1035_p4 = por %p56_p2, %p55_p1  ;;  %s41_s20 = ssub.s32 %s966_s13, %s1261_s17 }
   0xc   : > { %p110_p6 = scmp.eq.s32.totalorder %s702_s15, 1  ;;  %p46_p7 = scmp.eq.s32.totalorder %s41_s20, 0 }
   0xd   : > { %p1041_p8 = por %p62_p5, %p61_p3  ;;  %p116_p10 = scmp.eq.s32.totalorder %s703_s16, 1 }
   0xe   : > { %p1045_p9 = por %p110_p6, %p55_p1  ;;  %p803_p13 = scmp.lt.s32.totalorder %s970_s14, 2 }
   0xf   : > { %s1050_s23 = scalar_select %p46_p7, %s958_s11, %s48_s18  }
  0x10   : > { %s1248_s22 = scalar_select %p1045_p9, 1, 0 }
  0x11   : > { %p1052_p11 = por %p116_p10, %p61_p3  ;;  %s139_s25 = sand.u32 1, %s958_s11  }
  0x12   : > { %s788_s26 = smul.u32 48, %s139_s25  ;;  %p1062_p0 = pnand %p803_p13, %p1035_p4 }
  0x13   : > { %s1249_s24 = scalar_select %p1052_p11, 1, 0 }
  0x14   : > { %s789_s27 = smul.u32 768, %s966_s13  ;;  %s143_s4 = scalar_lea.vmem [#allocation3], %s788_s26 }
  0x15   : > { %s153_s5 = sshll.u32 %s143_s4, 4  ;;  %s1074_s6 = scalar_lea.sflag [#allocation4], %s139_s25  ;;  %s1071_s5 = int_to_ptr.vmem [resolvable:$true] %s153_s5 }
  0x16   : > { %s1069_s3 = scalar_lea.hbm %s1242_s0, %s789_s27  ;;  %p860_p3 = pneg %p1062_p0 }
  0x17   : > { %s858_s7 = scalar_lea.hbm %s1069_s3, 768  ;;  %s863_s16 = scalar_lea.hbm %s1242_s0, 1536 }
  0x18   : > { %p859_p2 = scmp.ne.s32.totalorder %s1069_s3, %s858_s7  ;;  %p864_p6 = scmp.lt.u32.totalorder %s1069_s3, %s1242_s0 }
  0x19   : > { %p865_p7 = scmp.lt.u32.totalorder %s863_s16, %s858_s7  ;;  %p867_p13 = scmp.lt.u32.totalorder %s858_s7, %s1069_s3 }
  0x1a   : > { %p861_p4 = pnand %p860_p3, %p859_p2 }
  0x1b   : > { %p866_p10 = por %p865_p7, %p864_p6 }
  0x1c   : > { %p862_p5 = pneg %p861_p4 }
  0x1d   : > { %p868_p12 = por %p867_p13, %p866_p10 }
  0x1f   : > { %p869_p1 = pnand %p868_p12, %p862_p5 }
  0x21   : > { %872 = shalt.err (!%p869_p1)
}
  0x22   : > { %s873_s20 = scalar_lea.vmem %s1071_s5, 768  ;;  %s972_s25 = smov [#allocation3]  }
  0x23   : > { %p874_p2 = scmp.ne.s32.totalorder %s1071_s5, %s873_s20  ;;  %s878_s26 = sshll.u32 %s972_s25, 4  ;;  %s879_s26 = int_to_ptr.vmem [resolvable:$false] %s878_s26 }
  0x24   : > { %s880_s27 = scalar_lea.vmem %s879_s26, 1536  ;;  %p881_p9 = scmp.lt.s32.totalorder %s1071_s5, %s879_s26 }
  0x25   : > { %p876_p4 = pnand %p874_p2, %p860_p3  ;;  %p882_p6 = scmp.lt.s32.totalorder %s880_s27, %s873_s20 }
  0x27   : > { %p877_p11 = pneg %p876_p4  ;;  %p883_p7 = por %p882_p6, %p881_p9 }
  0x29   : > { %p884_p10 = pnand %p883_p7, %p877_p11 }
  0x2b   : > { %887 = shalt.err (!%p884_p10)
}
  0x2c   : > { %s973_s29 = smov 64   ;;  %s974_s30 = smov 4  }
  0x2d   : > { %798 = dma.hbm_to_vmem [thread:$0]  (!%p1062_p0), %s1069_s3, 768, %s1071_s5, %s1074_s6, %s973_s29, %s973_s29, %s974_s30  }
  0x2e   : > { %p161_p12 = scmp.lt.s32.totalorder %s970_s14, 3  ;;  %p1251_p1 = scmp.ge.s32.totalorder %s970_s14, 1 }
  0x30   : > { %p162_p3 = pnand %p1251_p1, %p161_p12 }
  0x31   : > { %s1106_s4 = sand.u32 (!%p162_p3), 1, %s954_s10  }
  0x32   : > { %165 = sbr.rel (%p162_p3) target bundleno = 332 (0x14c), region = 28  ;;  %s168_s8 = scalar_lea.sflag (!%p162_p3), [#allocation4], %s1106_s4 }
  0x33   : > { %s790_s7 = smul.u32 (!%p162_p3), 48, %s1106_s4 }
  0x35   : > { %s1110_s15 = scalar_lea.vmem (!%p162_p3), [#allocation3], %s790_s7 }
  0x39   : > { %941 = dma.done.wait (%p1041_p8), %s168_s8, 768  }
  0x3a   : > { %943 = vsyncadd (%p1041_p8), %s168_s8, 4294966528  ;;  %v975_v0 = vmov 0.0|0.0   ;;  %vm976_vm0 = vmmov 0   ;;  %v977_v1 = vmov 0.0   ;;  %vm197_vm1 = vcmask 125952   ;;  %v717_v2 = vld [vmem:[%s1243_s1 + $0x10] sm:$0xff] }
  0x3b   : > { %771 = vmatprep.subr.bf16.mxu1 %v975_v0  ;;  %777 = vmatprep.subr.bf16.mxu0 %v975_v0  ;;  %v718_v3 = vld [vmem:[%s1243_s1 + $0x18] sm:$0xff]  ;;  %v721_v4 = vld [vmem:[%s1243_s1 + $0x20] sm:$0xff]  ;;  %v722_v6 = vld [vmem:[%s1243_s1 + $0x28] sm:$0xff]  ;;  %vm254_vm2 = vcmask 1041409   ;;  %vm257_vm3 = vcmask 1042434   ;;  %vm260_vm4 = vcmask 1043459  }
  0x3c   : > { %747 = vmatprep.mubr.msk.f32.mxu1 %vm976_vm0, %v977_v1  ;;  %761 = vmatprep.mubr.msk.f32.mxu0 %vm976_vm0, %v977_v1  ;;  %v772_v5 = vpack.c.bf16 %v718_v3, %v717_v2  ;;  %v193_v7 = vld [vmem:[%s1110_s15] sm:$0xf]  ;;  %v194_v8 = vld [vmem:[%s1110_s15 + $0x4] sm:$0xf]  ;;  %v778_v9 = vpack.c.bf16 %v722_v6, %v721_v4  ;;  %v195_v10 = vld [vmem:[%s1110_s15 + $0x8] sm:$0xf] }
  0x3d   : > { %v196_v11 = vld [vmem:[%s1110_s15 + $0xc] sm:$0xf]  ;;  %198 = vst.msk [vmem:[#allocation2] sm:$0xf] %vm197_vm1, %v193_v7  ;;  %199 = vst.msk [vmem:[#allocation2 + $0x4] sm:$0xf] %vm197_vm1, %v194_v8 }
  0x3e   : > { %773 = vmatpush3.bf16.msra.mxu1 %v772_v5  ;;  %200 = vst.msk [vmem:[#allocation2 + $0x8] sm:$0xf] %vm197_vm1, %v195_v10  ;;  %201 = vst.msk [vmem:[#allocation2 + $0xc] sm:$0xf] %vm197_vm1, %v196_v11  ;;  %779 = vmatpush3.bf16.msra.mxu0 %v778_v9  ;;  %v709_v12 = vld [vmem:[%s1110_s15 + $0x10] sm:$0xf] }
  0x3f   : > { %774 = vmatprep.subr.bf16.mxu1 %v975_v0  ;;  %780 = vmatprep.subr.bf16.mxu0 %v975_v0  ;;  %v710_v13 = vld [vmem:[%s1110_s15 + $0x14] sm:$0xf]  ;;  %v711_v14 = vld [vmem:[%s1110_s15 + $0x18] sm:$0xf]  ;;  %v712_v15 = vld [vmem:[%s1110_s15 + $0x1c] sm:$0xf] }
  0x40   : > { %v713_v24 = vld [vmem:[%s1110_s15 + $0x20] sm:$0xf]  ;;  %v714_v25 = vld [vmem:[%s1110_s15 + $0x24] sm:$0xf]  ;;  %v715_v26 = vld [vmem:[%s1110_s15 + $0x28] sm:$0xf] }
  0x41   : > { %v716_v27 = vld [vmem:[%s1110_s15 + $0x2c] sm:$0xf]  ;;  %vm262_vm5 = vcmask 130048   ;;  %v240_v36 = vld [vmem:[%s1243_s1] sm:$0xff]  ;;  %v724_v38 = vld [vmem:[%s1243_s1 + $0x30] sm:$0xff]  ;;  %s708_s15 = sshll.u32 %s1106_s4, 2 }
  0x42   : > { %v241_v37 = vld [vmem:[%s1243_s1 + $0x8] sm:$0xff]  ;;  %v725_v45 = vld [vmem:[%s1243_s1 + $0x38] sm:$0xff]  ;;  %s728_s28 = sshll.u32 %s962_s12, 6  ;;  %s191_s3 = scalar_lea.vmem [#allocation6], %s708_s15  ;;  %vm597_vm6 = vcmask 27648  }
  0x43   : > { %v775_v51 = vpack.c.bf16 %v241_v37, %v240_v36  ;;  %v781_v58 = vpack.c.bf16 %v725_v45, %v724_v38  ;;  %s615_s21 = sshll.u32 %s191_s3, 4  ;;  %s1193_s16 = scalar_lea.hbm %s1244_s2, %s728_s28  ;;  %s1195_s21 = int_to_ptr.vmem [resolvable:$true] %s615_s21 }
  0x44   : > { %v202_v16 = vld [vmem:[#allocation2] sm:$0xf]  ;;  %v203_v17 = vld [vmem:[#allocation2 + $0x4] sm:$0xf]  ;;  %s600_s18 = scalar_lea.sflag [#allocation5], %s1106_s4  ;;  %s888_s12 = scalar_lea.vmem %s1195_s21, 64 }
  0x45   : > { %v204_v18 = vld [vmem:[#allocation2 + $0x8] sm:$0xf]  ;;  %v205_v19 = vld [vmem:[#allocation2 + $0xc] sm:$0xf]  ;;  %v211_v20 = vadd.f32 %v709_v12, %v202_v16  ;;  %v212_v21 = vadd.f32 %v710_v13, %v203_v17  ;;  %p889_p8 = scmp.ne.s32.totalorder %s1195_s21, %s888_s12  ;;  %p1252_p9 = scmp.ne.s32.totalorder %s1248_s22, 0 }
  0x46   : > { %v213_v22 = vadd.f32 %v711_v14, %v204_v18  ;;  %v214_v23 = vadd.f32 %v712_v15, %v205_v19  ;;  %s978_s19 = smov [#allocation6]  }
  0x47   : > { %215 = vst.msk [vmem:[#allocation2] sm:$0xf] %vm197_vm1, %v211_v20  ;;  %216 = vst.msk [vmem:[#allocation2 + $0x4] sm:$0xf] %vm197_vm1, %v212_v21  ;;  %p890_p11 = pnand %p889_p8, %p1252_p9  ;;  %s892_s20 = sshll.u32 %s978_s19, 4  ;;  %s893_s20 = int_to_ptr.vmem [resolvable:$false] %s892_s20 }
  0x48   : > { %217 = vst.msk [vmem:[#allocation2 + $0x8] sm:$0xf] %vm197_vm1, %v213_v22  ;;  %218 = vst.msk [vmem:[#allocation2 + $0xc] sm:$0xf] %vm197_vm1, %v214_v23  ;;  %s894_s25 = scalar_lea.vmem %s893_s20, 128  ;;  %p895_p5 = scmp.lt.s32.totalorder %s1195_s21, %s893_s20 }
  0x49   : > { %p891_p0 = pneg %p890_p11  ;;  %p896_p13 = scmp.lt.s32.totalorder %s894_s25, %s888_s12 }
  0x4b   : > { %p897_p2 = por %p896_p13, %p895_p5 }
  0x4d   : > { %p898_p4 = pnand %p897_p2, %p891_p0 }
  0x4e   : > { %v219_v28 = vld [vmem:[#allocation2] sm:$0xf]  ;;  %v220_v29 = vld [vmem:[#allocation2 + $0x4] sm:$0xf] }
  0x4f   : > { %v221_v30 = vld [vmem:[#allocation2 + $0x8] sm:$0xf]  ;;  %v222_v31 = vld [vmem:[#allocation2 + $0xc] sm:$0xf]  ;;  %v228_v32 = vadd.f32 %v713_v24, %v219_v28  ;;  %v229_v33 = vadd.f32 %v714_v25, %v220_v29 }
  0x50   : > { %v230_v34 = vadd.f32 %v715_v26, %v221_v30  ;;  %v231_v35 = vadd.f32 %v716_v27, %v222_v31 }
  0x51   : > { %232 = vst.msk [vmem:[#allocation2] sm:$0xf] %vm197_vm1, %v228_v32  ;;  %233 = vst.msk [vmem:[#allocation2 + $0x4] sm:$0xf] %vm197_vm1, %v229_v33 }
  0x52   : > { %234 = vst.msk [vmem:[#allocation2 + $0x8] sm:$0xf] %vm197_vm1, %v230_v34  ;;  %235 = vst.msk [vmem:[#allocation2 + $0xc] sm:$0xf] %vm197_vm1, %v231_v35 }
  0x58   : > { %v242_v39 = vld [vmem:[#allocation2 + $0x1] sm:$0x1]  ;;  %v243_v40 = vld [vmem:[#allocation2 + $0x5] sm:$0x1]  ;;  %v417_v41 = vld [vmem:[#allocation2 + $0x2] sm:$0x1] }
  0x59   : > { %v244_v42 = vld [vmem:[#allocation2 + $0x9] sm:$0x1]  ;;  %v245_v43 = vld [vmem:[#allocation2 + $0xd] sm:$0x1]  ;;  %v253_v44 = vrot.slane %v243_v40, 7 }
  0x5a   : > { %v256_v46 = vrot.slane %v244_v42, 6  ;;  %v259_v47 = vrot.slane %v245_v43, 5  ;;  %v418_v48 = vld [vmem:[#allocation2 + $0x6] sm:$0x1]  ;;  %v419_v49 = vld [vmem:[#allocation2 + $0xa] sm:$0x1] }
  0x5b   : > { %v255_v50 = vsel %vm254_vm2, %v253_v44, %v242_v39  ;;  %v420_v52 = vld [vmem:[#allocation2 + $0xe] sm:$0x1]  ;;  %v428_v53 = vrot.slane %v418_v48, 7  ;;  %v430_v54 = vrot.slane %v419_v49, 6  ;;  %v236_v55 = vld [vmem:[#allocation2] sm:$0x1] }
  0x5c   : > { %v258_v56 = vsel %vm257_vm3, %v256_v46, %v255_v50  ;;  %v432_v57 = vrot.slane %v420_v52, 5  ;;  %v237_v59 = vld [vmem:[#allocation2 + $0x4] sm:$0x1]  ;;  %v238_v60 = vld [vmem:[#allocation2 + $0x8] sm:$0x1] }
  0x5d   : > { %v261_v61 = vsel %vm260_vm4, %v259_v47, %v258_v56  ;;  %v429_v62 = vsel %vm254_vm2, %v428_v53, %v417_v41  ;;  %v239_v63 = vld [vmem:[#allocation2 + $0xc] sm:$0x1]  ;;  %v339_v0 = vrot.slane %v237_v59, 7  ;;  %v341_v2 = vrot.slane %v238_v60, 6  ;;  %v507_v3 = vld [vmem:[#allocation2 + $0x3] sm:$0x1] }
  0x5e   : > { %748 = vmatmul.mubr.msk.f32.vlgmr.msra.gmra.mrb[0].mxu1 %vm262_vm5, %v261_v61  ;;  %v431_v4 = vsel %vm257_vm3, %v430_v54, %v429_v62  ;;  %v343_v5 = vrot.slane %v239_v63, 5  ;;  %v508_v6 = vld [vmem:[#allocation2 + $0x7] sm:$0x1]  ;;  %v509_v7 = vld [vmem:[#allocation2 + $0xb] sm:$0x1] }
  0x5f   : > { %776 = vmatpush3.bf16.msra.mxu1 %v775_v51  ;;  %v433_v8 = vsel %vm260_vm4, %v432_v57, %v431_v4  ;;  %754 = vmatprep.mubr.msk.f32.mxu1 %vm976_vm0, %v977_v1  ;;  %v340_v9 = vsel %vm254_vm2, %v339_v0, %v236_v55  ;;  %v510_v10 = vld [vmem:[#allocation2 + $0xf] sm:$0x1]  ;;  %v518_v11 = vrot.slane %v508_v6, 7  ;;  %v520_v12 = vrot.slane %v509_v7, 6 }
  0x60   : > { %762 = vmatmul.mubr.msk.f32.vlgmr.msra.gmra.mrb[0].mxu0 %vm262_vm5, %v433_v8  ;;  %v342_v13 = vsel %vm257_vm3, %v341_v2, %v340_v9  ;;  %v522_v15 = vrot.slane %v510_v10, 5 }
  0x61   : > { %782 = vmatpush3.bf16.msra.mxu0 %v781_v58  ;;  %768 = vmatprep.mubr.msk.f32.mxu0 %vm976_vm0, %v977_v1  ;;  %v519_v14 = vsel %vm254_vm2, %v518_v11, %v507_v3  ;;  %v344_v17 = vsel %vm260_vm4, %v343_v5, %v342_v13 }
  0x62   : > { %v521_v16 = vsel %vm257_vm3, %v520_v12, %v519_v14 }
  0x63   : > { %v523_v18 = vsel %vm260_vm4, %v522_v15, %v521_v16 }
  0x66   : > { %755 = vmatmul.mubr.msk.f32.vlgmr.msra.gmra.mrb[0].mxu1 %vm262_vm5, %v344_v17 }
  0x68   : > { %769 = vmatmul.mubr.msk.f32.vlgmr.msra.gmra.mrb[0].mxu0 %vm262_vm5, %v523_v18 }
 0x139   : > { %v413_v19 = vpop.f32.mrb[0].mxu1 }
 0x13a   : > { %v756_v1 = vpop.f32.mrb[1].mxu1 }
 0x13b   : > { %v592_v20 = vpop.f32.mrb[0].mxu0 }
 0x13c   : > { %v783_v21 = vadd.f32 %v592_v20, %v413_v19  ;;  %v770_v22 = vpop.f32.mrb[1].mxu0 }
 0x13e   : > { %598 = vst.msk [vmem:[%s191_s3] sm:$0xf] %vm597_vm6, %v783_v21 }
 0x13f   : > { %901 = shalt.err (!%p898_p4)
}
 0x140   : > { %s902_s4 = scalar_lea.hbm %s1193_s16, 64  ;;  %s906_s29 = scalar_lea.hbm %s1244_s2, 128 }
 0x141   : > { %p903_p6 = scmp.ne.s32.totalorder %s1193_s16, %s902_s4  ;;  %p907_p12 = scmp.lt.u32.totalorder %s1193_s16, %s1244_s2 }
 0x142   : > { %p908_p1 = scmp.lt.u32.totalorder %s906_s29, %s902_s4  ;;  %p910_p8 = scmp.lt.u32.totalorder %s902_s4, %s1193_s16 }
 0x143   : > { %p904_p7 = pnand %p903_p6, %p1252_p9 }
 0x144   : > { %p909_p3 = por %p908_p1, %p907_p12 }
 0x145   : > { %p905_p10 = pneg %p904_p7 }
 0x146   : > { %p911_p11 = por %p910_p8, %p909_p3 }
 0x148   : > { %p912_p0 = pnand %p911_p11, %p905_p10 }
 0x14a   : > { %915 = shalt.err (!%p912_p0)
}
 0x14b   : > { %793 = dma.vmem_to_hbm [thread:$0]  (%p1252_p9), %s1195_s21, 64, %s1193_s16, %s600_s18  }
 0x14c PF: > { %s627_s8 = sand.u32 1, %s950_s9   ;;  %p1253_p5 = scmp.ne.s32.totalorder %s1249_s24, 0 }
 0x14d   : > { %p1254_p13 = scmp.ge.s32.totalorder %s970_s14, 2  ;;  %s628_s15 = scalar_lea.sflag [#allocation5], %s627_s8 }
 0x14f   : > { %p800_p2 = pnand %p1254_p13, %p1253_p5 }
 0x151   : > { %945 = dma.done.wait (!%p800_p2), %s628_s15, 64  }
 0x152   : > { %947 = vsyncadd (!%p800_p2), %s628_s15, 4294967232  ;;  %s18_s14 = sadd.s32 1, %s970_s14   ;;  %s1255_s9 = smov %s954_s10 }
 0x153   : > { %p15_p4 = scmp.ge.s32.totalorder %s18_s14, 4   ;;  %s1256_s10 = smov %s958_s11 }
 0x154   : > { %s1257_s11 = smov %s1050_s23  ;;  %s1258_s12 = smov %s966_s13 }
 0x155   : > { %s1259_s13 = smov %s1261_s17  ;;  %17 = sbr.rel (!%p15_p4) target bundleno = 6 (0x6), region = 78 }
 0x15c   :  { %633 = vsyncpa [#allocation4], 1 }
 0x15d   :  { %635 = vsyncpa [#allocation4 + $0x1], 1 }
 0x15e   :  { %636 = vsyncpa [#allocation5], 1 }
 0x15f   :  { %638 = vsyncpa [#allocation5 + $0x1], 1 }

</bundles_post_ra>
